<compile_context>
chip_gen: v5e
topology: v5e:2x2
jax: 0.10.0
libtpu: 0.0.40
codegen_flags: <defaults>
</compile_context>

<pallas_src>
import jax
import jax.numpy as jnp
from jax.experimental import pallas as pl
from jax.experimental.pallas import tpu as pltpu


# ----------------------------------------------------------------------------
# Parameters (deterministic synthetic init)
# ----------------------------------------------------------------------------
def init_params(key, channels, latent_channels):
    k = iter(jax.random.split(key, 8))
    w_enc = 0.1 * jax.random.normal(next(k), (latent_channels, channels), jnp.float32)
    b_enc = 0.1 * jax.random.normal(next(k), (latent_channels,), jnp.float32)
    gamma = 1.0 + 0.1 * jax.random.normal(next(k), (latent_channels,), jnp.float32)
    beta = 0.1 * jax.random.normal(next(k), (latent_channels,), jnp.float32)
    mean = 0.1 * jax.random.normal(next(k), (latent_channels,), jnp.float32)
    var = jax.random.uniform(next(k), (latent_channels,), jnp.float32, 0.5, 1.5)
    w_dec = 0.1 * jax.random.normal(next(k), (channels, latent_channels), jnp.float32)
    b_dec = 0.1 * jax.random.normal(next(k), (channels,), jnp.float32)
    return dict(w_enc=w_enc, b_enc=b_enc, gamma=gamma, beta=beta,
                mean=mean, var=var, w_dec=w_dec, b_dec=b_dec)


# ----------------------------------------------------------------------------
# Wrapper: fold BN + decoder, pack params, call the one-shot Pallas kernel
# ----------------------------------------------------------------------------
def autoencoder_forward(x_nchw, params, eps=1e-5):
    B, C, H, W = x_nchw.shape
    HW = H * W
    N = B * HW                                   # lane axis width (512 here)
    Cl = params["w_enc"].shape[0]
    K = 8                                        # padded contraction / sublane dim

    # --- fold eval-mode BN into the encoder 1x1 conv ------------------------
    s = params["gamma"] / jnp.sqrt(params["var"] + eps)
    w1f = params["w_enc"] * s[:, None]                              # (Cl, C)
    b1f = (params["b_enc"] - params["mean"]) * s + params["beta"]   # (Cl,)

    # --- pre-fold decoder through the (BN-folded) encoder --------------------
    w_out = params["w_dec"] @ w1f                                   # (C, C)
    b_out = params["w_dec"] @ b1f + params["b_dec"]                 # (C,)

    # --- one packed (8, 8) parameter block -----------------------------------
    #   rows 0..Cl-1 : [ w1f   | b1f  | 0 ]   -> hidden rows
    #   rows Cl..Cl+C-1 : [ w_out | b_out| 0 ] -> out rows
    p = jnp.zeros((K, K), jnp.float32)
    p = p.at[:Cl, :C].set(w1f).at[:Cl, C].set(b1f)
    p = p.at[Cl:Cl + C, :C].set(w_out).at[Cl:Cl + C, C].set(b_out)

    # --- lane-dense activations: (C, B*HW) + ones row (bias) + zero pad ------
    x = jnp.transpose(x_nchw, (1, 0, 2, 3)).reshape(C, N).astype(jnp.float32)
    x_aug = jnp.concatenate(
        [x, jnp.ones((1, N), jnp.float32), jnp.zeros((K - C - 1, N), jnp.float32)],
        axis=0)                                                      # (8, N)

    def kernel(p_ref, x_ref, hid_ref, out_ref):
        # single (8,8)@(8,N) MXU pass; hidden and out are row-slices of the result
        full = jnp.dot(p_ref[...], x_ref[...],
                       preferred_element_type=jnp.float32)           # (8, N)
        hid_ref[...] = full[:Cl, :]
        out_ref[...] = full[Cl:Cl + C, :]

    hidden2d, out2d = pl.pallas_call(
        kernel,
        out_shape=(jax.ShapeDtypeStruct((Cl, N), jnp.float32),
                   jax.ShapeDtypeStruct((C, N), jnp.float32)),
        grid_spec=pltpu.PrefetchScalarGridSpec(
            num_scalar_prefetch=0,
            grid=(1,),
            in_specs=[pl.BlockSpec((K, K), lambda i: (0, 0)),        # packed params
                      pl.BlockSpec((K, N), lambda i: (0, 0))],       # x (bias-augmented)
            out_specs=(pl.BlockSpec((Cl, N), lambda i: (0, 0)),
                       pl.BlockSpec((C, N), lambda i: (0, 0))),
        ),
        compiler_params=pltpu.CompilerParams(
            dimension_semantics=("arbitrary",)),
    )(p, x_aug)

    hidden = jnp.transpose(hidden2d.reshape(Cl, B, H, W), (1, 0, 2, 3))
    out = jnp.transpose(out2d.reshape(C, B, H, W), (1, 0, 2, 3))
    return hidden, out


# ----------------------------------------------------------------------------
# Pure-JAX reference (un-folded convs + eval-mode BN) for correctness check
# ----------------------------------------------------------------------------
def reference_forward(x, params, eps=1e-5):
    def conv1x1(h, w, b):
        y = jax.lax.conv_general_dilated(
            h, w[:, :, None, None], (1, 1), "VALID",
            dimension_numbers=("NCHW", "OIHW", "NCHW"))
        return y + b[None, :, None, None]

    h = conv1x1(x.astype(jnp.float32), params["w_enc"], params["b_enc"])
    s = params["gamma"] / jnp.sqrt(params["var"] + eps)
    h = ((h - params["mean"][None, :, None, None])
         * s[None, :, None, None] + params["beta"][None, :, None, None])
    out = conv1x1(h, params["w_dec"], params["b_dec"])
    return h, out


# ----------------------------------------------------------------------------
if __name__ == "__main__":
    key = jax.random.PRNGKey(0)
    kx, kp = jax.random.split(key)

    B, C, H, W = 2, 4, 16, 16          # channels=4
    Cl = 2                              # latent_channels=2
    x = jax.random.normal(kx, (B, C, H, W), jnp.float32)
    params = init_params(kp, C, Cl)

    hidden, out = autoencoder_forward(x, params)
    jax.block_until_ready((hidden, out))

    h_ref, o_ref = reference_forward(x, params)
    assert hidden.shape == (B, Cl, H, W) and out.shape == (B, C, H, W)
    err_h = float(jnp.max(jnp.abs(hidden - h_ref)))
    err_o = float(jnp.max(jnp.abs(out - o_ref)))
    assert err_h < 1e-4 and err_o < 1e-4, f"mismatch vs reference: {err_h} {err_o}"

    print("KERNEL_OK")
</pallas_src>

<mosaic_0001>
module attributes {stable_mosaic.version = 11 : i64} {
  func.func @kernel(%arg0: i32, %arg1: memref<8x8xf32, #tpu.memory_space<vmem>>, %arg2: memref<8x512xf32, #tpu.memory_space<vmem>>, %arg3: memref<2x512xf32, #tpu.memory_space<vmem>>, %arg4: memref<4x512xf32, #tpu.memory_space<vmem>>) attributes {dimension_semantics = [#tpu.dimension_semantics<arbitrary>], iteration_bounds = array<i64: 1>, scalar_prefetch = 0 : i64, scratch_operands = 0 : i64, tpu.core_type = #tpu.core_type<tc>, window_params = [{pipeline_mode = #tpu.pipeline_mode<synchronous>, transform_indices = @transform_0, window_bounds = array<i64: 8, 8>}, {pipeline_mode = #tpu.pipeline_mode<synchronous>, transform_indices = @transform_1, window_bounds = array<i64: 8, 512>}, {pipeline_mode = #tpu.pipeline_mode<synchronous>, transform_indices = @transform_2, window_bounds = array<i64: 2, 512>}, {pipeline_mode = #tpu.pipeline_mode<synchronous>, transform_indices = @transform_3, window_bounds = array<i64: 4, 512>}]} {
    %c0 = arith.constant 0 : index
    %c0_0 = arith.constant 0 : index
    %0 = vector.load %arg1[%c0, %c0_0] : memref<8x8xf32, #tpu.memory_space<vmem>>, vector<8x8xf32>
    %c0_1 = arith.constant 0 : index
    %c0_2 = arith.constant 0 : index
    %1 = vector.load %arg2[%c0_1, %c0_2] : memref<8x512xf32, #tpu.memory_space<vmem>>, vector<8x512xf32>
    %cst = arith.constant dense<0.000000e+00> : vector<8x512xf32>
    %2 = tpu.matmul %0, %1, %cst {dimension_numbers = #tpu.dot_dimension_numbers<[1], [0], [0], [1], [0, 0, 1, 1], [], []>} : vector<8x8xf32>, vector<8x512xf32>, vector<8x512xf32> -> vector<8x512xf32>
    %3 = vector.extract_strided_slice %2 {offsets = [0, 0], sizes = [2, 512], strides = [1, 1]} : vector<8x512xf32> to vector<2x512xf32>
    %c0_3 = arith.constant 0 : index
    %c0_4 = arith.constant 0 : index
    %4 = vector.load %arg3[%c0_3, %c0_4] : memref<2x512xf32, #tpu.memory_space<vmem>>, vector<2x512xf32>
    tpu.vector_store %arg3[%c0_3, %c0_4], %3 {strides = array<i32>} : memref<2x512xf32, #tpu.memory_space<vmem>>, vector<2x512xf32>,
    %5 = vector.extract_strided_slice %2 {offsets = [2, 0], sizes = [4, 512], strides = [1, 1]} : vector<8x512xf32> to vector<4x512xf32>
    %c0_5 = arith.constant 0 : index
    %c0_6 = arith.constant 0 : index
    %6 = vector.load %arg4[%c0_5, %c0_6] : memref<4x512xf32, #tpu.memory_space<vmem>>, vector<4x512xf32>
    tpu.vector_store %arg4[%c0_5, %c0_6], %5 {strides = array<i32>} : memref<4x512xf32, #tpu.memory_space<vmem>>, vector<4x512xf32>,
    return
  }
  func.func @transform_0(%arg0: i32) -> (i32, i32) {
    %c0_i32 = arith.constant 0 : i32
    %c0_i32_0 = arith.constant 0 : i32
    %c0_i32_1 = arith.constant 0 : i32
    return %c0_i32, %c0_i32_0 : i32, i32
  }
  func.func @transform_1(%arg0: i32) -> (i32, i32) {
    %c0_i32 = arith.constant 0 : i32
    %c0_i32_0 = arith.constant 0 : i32
    %c0_i32_1 = arith.constant 0 : i32
    return %c0_i32, %c0_i32_0 : i32, i32
  }
  func.func @transform_2(%arg0: i32) -> (i32, i32) {
    %c0_i32 = arith.constant 0 : i32
    %c0_i32_0 = arith.constant 0 : i32
    %c0_i32_1 = arith.constant 0 : i32
    return %c0_i32, %c0_i32_0 : i32, i32
  }
  func.func @transform_3(%arg0: i32) -> (i32, i32) {
    %c0_i32 = arith.constant 0 : i32
    %c0_i32_0 = arith.constant 0 : i32
    %c0_i32_1 = arith.constant 0 : i32
    return %c0_i32, %c0_i32_0 : i32, i32
  }
}

</mosaic_0001>

<bundles_post_ra>
// kernel: tpu_custom_call.1
= control target key start
LH: loop header
LB: loop body
LE: loop exit
PB: predicated region body
PF: predicated region fallthrough
CT: control target
= control target key end

     0   :  { %9 = vsyncpa [#allocation3], 0  ;;  %s369_s0 = inlined_call_operand.hbm [shape: f32[8,8], index: 0, kind: input, shape index: {}]   ;;  %s370_s1 = inlined_call_operand.hbm [shape: f32[8,512], index: 1, kind: input, shape index: {}]   ;;  %s371_s2 = inlined_call_operand.hbm [shape: f32[2,512], index: 2, kind: output, shape index: {0}]   ;;  %s372_s3 = inlined_call_operand.hbm [shape: f32[4,512], index: 3, kind: output, shape index: {1}]  }
   0x1   :  { %10 = vsyncpa [#allocation6], 0 }
   0x2   :  { %11 = vsyncpa [#allocation4], 0 }
   0x3   :  { %12 = vsyncpa [#allocation9], 0  ;;  %s18_s14 = sshll.u32 %s369_s0, 4  ;;  %s318_s15 = smov [#allocation2]   ;;  %s19_s14 = int_to_ptr.hbm [resolvable:$true] %s18_s14 }
   0x4   :  { %s20_s16 = sshll.u32 %s318_s15, 4  ;;  %s29_s19 = sshll.u32 %s370_s1, 4  ;;  %s21_s16 = int_to_ptr.vmem [resolvable:$true] %s20_s16  ;;  %s30_s19 = int_to_ptr.hbm [resolvable:$true] %s29_s19 }
   0x5   :  { %23 = dma.hbm_to_vmem [thread:$0]  %s19_s14, 128, %s21_s16, [#allocation3]  }
   0x6   :  { %s319_s20 = smov [#allocation5]  }
   0x7   :  { %s31_s21 = sshll.u32 %s319_s20, 4  ;;  %s32_s21 = int_to_ptr.vmem [resolvable:$true] %s31_s21 }
   0x8   :  { %34 = dma.hbm_to_vmem [thread:$0]  %s30_s19, 512, %s32_s21, [#allocation6]  }
   0x9   :  { %310 = dma.done.wait [#allocation3], 128  }
   0xa   :  { %311 = vsyncadd [#allocation3], 4294967168 }
   0xb   :  { %312 = dma.done.wait [#allocation6], 512  }
   0xc   :  { %313 = vsyncadd [#allocation6], 4294966784  ;;  %vm48_vm0 = vcmask 64512   ;;  %v46_v0 = vld [vmem:[#allocation5 + $0x10] sm:$0xff]  ;;  %v47_v1 = vld [vmem:[#allocation5 + $0x18] sm:$0xff]  ;;  %vm143_vm1 = vcmask 1043456  }
   0xd   :  { %v43_v2 = vld [vmem:[#allocation2] sm:$0xff]  ;;  %107 = vmatpush.msra.mxu2 %v46_v0  ;;  %127 = vmatpush.msra.mxu3 %v47_v1  ;;  %v45_v3 = vld [vmem:[#allocation5 + $0x8] sm:$0xff]  ;;  %v44_v4 = vld [vmem:[#allocation5] sm:$0xff]  ;;  %vm141_vm2 = vcmask 1045508   ;;  %vm139_vm3 = vcmask 1041408   ;;  %s320_s0 = smov [#allocation7]  }
   0xe   :  { %204 = vmatmul.msk.f32.vlgmr.msra.gmra.mxu2 %vm48_vm0, %v43_v2  ;;  %205 = vmatmul.msk.f32.vlgmr.msra.gmra.mxu3 %vm48_vm0, %v43_v2  ;;  %vm351_vm4 = vmor %vm139_vm3, %vm141_vm2  ;;  %s173_s1 = sshll.u32 %s320_s0, 4  ;;  %s175_s24 = sshll.u32 %s371_s2, 4  ;;  %s174_s1 = int_to_ptr.vmem [resolvable:$true] %s173_s1  ;;  %s176_s24 = int_to_ptr.hbm [resolvable:$true] %s175_s24 }
   0xf   :  { %87 = vmatpush.msra.mxu1 %v45_v3  ;;  %67 = vmatpush.msra.mxu0 %v44_v4  ;;  %s321_s25 = smov [#allocation8]   ;;  %s186_s29 = sshll.u32 %s372_s3, 4  ;;  %s187_s29 = int_to_ptr.hbm [resolvable:$true] %s186_s29 }
  0x10   :  { %203 = vmatmul.msk.f32.vlgmr.msra.gmra.mxu1 %vm48_vm0, %v43_v2  ;;  %202 = vmatmul.msk.f32.vlgmr.msra.gmra.mxu0 %vm48_vm0, %v43_v2  ;;  %s184_s26 = sshll.u32 %s321_s25, 4  ;;  %s185_s26 = int_to_ptr.vmem [resolvable:$true] %s184_s26 }
  0x8d   :  { %v89_v5 = vpop.f32.mrf.mxu1  ;;  %v69_v6 = vpop.f32.mrf.mxu0 }
  0x8e   :  { %v136_v7 = vrot.slane %v89_v5, 6  ;;  %v147_v8 = vrot.slane %v89_v5, 4 }
  0x90   :  { %v149_v9 = vsel %vm143_vm1, %v69_v6, %v147_v8  ;;  %v151_v10 = vsel %vm143_vm1, %v147_v8, %v69_v6  ;;  %v140_v19 = vsel %vm139_vm3, %v69_v6, %v136_v7 }
  0x91   :  { %v109_v12 = vpop.f32.mrf.mxu2  ;;  %v129_v13 = vpop.f32.mrf.mxu3  ;;  %v206_v14 = vrot.slane %v149_v9, 10  ;;  %v207_v15 = vrot.slane %v151_v10, 10 }
  0x92   :  { %v137_v16 = vrot.slane %v109_v12, 4  ;;  %v138_v17 = vrot.slane %v129_v13, 2  ;;  %v148_v18 = vrot.slane %v129_v13, 4 }
  0x93   :  { %v159_v20 = vsel %vm351_vm4, %v206_v14, %v207_v15 }
  0x94   :  { %v142_v21 = vsel %vm141_vm2, %v137_v16, %v138_v17  ;;  %v150_v22 = vsel %vm143_vm1, %v109_v12, %v148_v18  ;;  %v153_v23 = vsel %vm143_vm1, %v148_v18, %v109_v12  ;;  %166 = vst [vmem:[#allocation8] sm:$0xff] %v159_v20 }
  0x95   :  { %v208_v24 = vrot.slane %v150_v22, 10  ;;  %v209_v25 = vrot.slane %v153_v23, 10  ;;  %v144_v26 = vsel %vm143_vm1, %v140_v19, %v142_v21 }
  0x96   :  { %146 = vst [vmem:[#allocation7] sm:$0xff] %v144_v26 }
  0x97   :  { %178 = dma.vmem_to_hbm [thread:$0]  %s174_s1, 128, %s176_s24, [#allocation4]   ;;  %v163_v27 = vsel %vm351_vm4, %v208_v24, %v209_v25 }
  0x98   :  { %167 = vst [vmem:[#allocation8 + $0x8] sm:$0xff] %v163_v27 }
  0x99   :  { %189 = dma.vmem_to_hbm [thread:$0]  %s185_s26, 256, %s187_s29, [#allocation9]  }
  0x9a   :  { %314 = dma.done.wait [#allocation4], 128  }
  0x9b   :  { %315 = vsyncadd [#allocation4], 4294967168 }
  0x9c   :  { %316 = dma.done.wait [#allocation9], 256  }
  0x9d   :  { %317 = vsyncadd [#allocation9], 4294967040 }
  0x9e   :  { %198 = vsyncpa [#allocation3], 1 }
  0x9f   :  { %199 = vsyncpa [#allocation6], 1 }
  0xa0   :  { %200 = vsyncpa [#allocation4], 1 }
  0xa1   :  { %201 = vsyncpa [#allocation9], 1 }

</bundles_post_ra>
